<compile_context>
chip_gen: v7x
topology: tpu7x:2x2x1
jax: 0.10.0
libtpu: 0.0.40
codegen_flags: <defaults>
</compile_context>

<pallas_src>
import jax
import jax.numpy as jnp
from jax.experimental import pallas as pl
from jax.experimental.pallas import tpu as pltpu


def _cdiv(a, b):
    return -(-a // b)


def _pooling_kernel(emb_ref, mask_ref, sum_ref, max_ref):
    # emb_ref : (TB, S, TD) block of token embeddings (input dtype)
    # mask_ref: (TB, S, 1)  block of attention mask (f32)
    emb = emb_ref[...]                                   # (TB, S, TD)
    mask3 = mask_ref[...]                                # (TB, S, 1) f32

    # mean-pooling numerator: f32 accumulation of emb * mask (matches torch)
    sum_ref[...] = jnp.sum(emb.astype(jnp.float32) * mask3, axis=1)

    # max-pooling: masked positions -> -1e9 in the input dtype
    # (exactly torch's in-place masked fill; independent of the sum temp)
    neg = jnp.asarray(-1000000000.0, dtype=emb.dtype)
    max_ref[...] = jnp.max(jnp.where(mask3 != 0.0, emb, neg), axis=1)


def _pick_tiles(B, S, D, itemsize, budget_bytes=2 << 20):
    """Pick (tb, td): batch-rows and D-lanes per grid step.

    Targets ~2 MiB per input tile (85%+ of HBM roofline per measured data),
    keeps output blocks sublane-full for the dtype, and keeps >=2 grid steps
    where possible so v7x can shard across its 2 TensorCores.
    """
    base_tb = 16 if itemsize <= 2 else 8

    def tile_bytes(tb, td):
        return tb * S * td * itemsize

    # Lane (D) tile: prefer full D; tile in 128-multiples only if needed.
    if D % 128 != 0 or tile_bytes(base_tb, D) <= budget_bytes:
        td = D
    else:
        td = 128
        for cand in (2048, 1024, 512, 256):
            if D % cand == 0 and tile_bytes(base_tb, cand) <= budget_bytes:
                td = cand
                break
        # TODO(synk): for extreme S where even (base_tb, S, 128) exceeds the
        # budget, an S-tiled accumulator grid axis would be needed; we rely on
        # the explicit vmem_limit_bytes headroom instead.

    n_d = D // td

    # Batch tile: cover tiny batches exactly (block dim == full array dim),
    # otherwise grow in powers of two of base_tb within budget, never past B,
    # and without collapsing the grid below 2 steps when it had >=2.
    if B <= base_tb:
        tb = B
    else:
        tb = base_tb
        while True:
            nxt = tb * 2
            if nxt > B or tile_bytes(nxt, td) > budget_bytes:
                break
            if n_d * _cdiv(B, nxt) < 2 <= n_d * _cdiv(B, tb):
                break
            tb = nxt
    return tb, td


def _pooling_reduce(token_embeddings, attention_mask):
    """Run the Pallas reduction kernel.

    token_embeddings: [B, S, D]
    attention_mask  : [B, S]
    returns (sum_embeddings [B, D] f32, max_over_time [B, D] input-dtype,
             sum_mask [B, 1] f32)
    """
    B, S, D = token_embeddings.shape
    itemsize = jnp.dtype(token_embeddings.dtype).itemsize

    # mask count (mean denominator, pre-clamp) — trivial reduction, do it in XLA
    mask_f32 = attention_mask.astype(jnp.float32)
    sum_mask = jnp.sum(mask_f32, axis=1, keepdims=True)          # [B, 1]
    mask3 = mask_f32[:, :, None]                                 # [B, S, 1]

    tb, td = _pick_tiles(B, S, D, itemsize)
    grid = (_cdiv(B, tb), D // td)

    # Explicit VMEM budget: double-buffered I/O tiles + f32 intermediates.
    in_tile = tb * S * td * itemsize
    f32_tile = tb * S * td * 4
    mask_tile = tb * S * 4
    out_tile = tb * td * (4 + itemsize)
    vmem_limit = 2 * (in_tile + mask_tile + out_tile) + 3 * f32_tile + (4 << 20)
    vmem_limit = int(min(max(vmem_limit, 16 << 20), 48 << 20))

    out_shapes = (
        jax.ShapeDtypeStruct((B, D), jnp.float32),              # masked sum
        jax.ShapeDtypeStruct((B, D), token_embeddings.dtype),   # masked max
    )

    sum_emb, max_emb = pl.pallas_call(
        _pooling_kernel,
        out_shape=out_shapes,
        grid_spec=pltpu.PrefetchScalarGridSpec(
            num_scalar_prefetch=0,
            grid=grid,
            in_specs=[
                pl.BlockSpec((tb, S, td), lambda b, d: (b, 0, d)),
                pl.BlockSpec((tb, S, 1), lambda b, d: (b, 0, 0)),
            ],
            out_specs=[
                pl.BlockSpec((tb, td), lambda b, d: (b, d)),
                pl.BlockSpec((tb, td), lambda b, d: (b, d)),
            ],
        ),
        compiler_params=pltpu.CompilerParams(
            dimension_semantics=("parallel", "parallel"),
            vmem_limit_bytes=vmem_limit),
    )(token_embeddings, mask3)

    return sum_emb, max_emb, sum_mask


class Pooling:
    """JAX/Pallas port of the PyTorch Pooling module (forward semantics)."""

    def __init__(self,
                 word_embedding_dimension: int,
                 pooling_mode_cls_token: bool = False,
                 pooling_mode_max_tokens: bool = False,
                 pooling_mode_mean_tokens: bool = True,
                 pooling_mode_mean_sqrt_len_tokens: bool = False):
        self.word_embedding_dimension = word_embedding_dimension
        self.pooling_mode_cls_token = pooling_mode_cls_token
        self.pooling_mode_mean_tokens = pooling_mode_mean_tokens
        self.pooling_mode_max_tokens = pooling_mode_max_tokens
        self.pooling_mode_mean_sqrt_len_tokens = pooling_mode_mean_sqrt_len_tokens
        multiplier = sum([pooling_mode_cls_token, pooling_mode_max_tokens,
                          pooling_mode_mean_tokens, pooling_mode_mean_sqrt_len_tokens])
        self.pooling_output_dimension = multiplier * word_embedding_dimension

    def __call__(self, features):
        token_embeddings = features['token_embeddings']        # [B, S, D]
        cls_token = features['cls_token_embeddings']            # [B, D]
        attention_mask = features['attention_mask']             # [B, S]

        need_reduce = (self.pooling_mode_max_tokens
                       or self.pooling_mode_mean_tokens
                       or self.pooling_mode_mean_sqrt_len_tokens)
        if need_reduce:
            sum_embeddings, max_over_time, sum_mask = _pooling_reduce(
                token_embeddings, attention_mask)

        output_vectors = []
        if self.pooling_mode_cls_token:
            output_vectors.append(cls_token.astype(jnp.float32))
        if self.pooling_mode_max_tokens:
            output_vectors.append(max_over_time.astype(jnp.float32))
        if self.pooling_mode_mean_tokens or self.pooling_mode_mean_sqrt_len_tokens:
            if 'token_weights_sum' in features:
                sm = features['token_weights_sum'].astype(jnp.float32)[:, None]
            else:
                sm = sum_mask                                    # [B, 1]
            sm = jnp.clip(sm, 1e-9, None)
            if self.pooling_mode_mean_tokens:
                output_vectors.append(sum_embeddings / sm)
            if self.pooling_mode_mean_sqrt_len_tokens:
                output_vectors.append(sum_embeddings / jnp.sqrt(sm))

        output_vector = jnp.concatenate(output_vectors, axis=1)
        out = dict(features)
        out['sentence_embedding'] = output_vector
        return out

    def get_sentence_embedding_dimension(self):
        return self.pooling_output_dimension


def _reference_forward(features, module: Pooling):
    """Pure-jnp replica of the PyTorch forward, for verification."""
    emb = features['token_embeddings'].astype(jnp.float32)
    cls = features['cls_token_embeddings'].astype(jnp.float32)
    mask = features['attention_mask'].astype(jnp.float32)[..., None]
    outs = []
    if module.pooling_mode_cls_token:
        outs.append(cls)
    if module.pooling_mode_max_tokens:
        filled = jnp.where(mask == 0, -1000000000.0, emb)
        outs.append(jnp.max(filled, axis=1))
    if module.pooling_mode_mean_tokens or module.pooling_mode_mean_sqrt_len_tokens:
        sum_emb = jnp.sum(emb * mask, axis=1)
        if 'token_weights_sum' in features:
            sum_mask = features['token_weights_sum'].astype(jnp.float32)[:, None]
        else:
            sum_mask = jnp.sum(mask, axis=1)
        sum_mask = jnp.clip(sum_mask, 1e-9, None)
        if module.pooling_mode_mean_tokens:
            outs.append(sum_emb / sum_mask)
        if module.pooling_mode_mean_sqrt_len_tokens:
            outs.append(sum_emb / jnp.sqrt(sum_mask))
    return jnp.concatenate(outs, axis=1)


if __name__ == "__main__":
    key = jax.random.PRNGKey(0)

    # ---- test 1: small shapes, all pooling branches (cls + max + mean + mean_sqrt) ----
    B, S, D = 2, 8, 32
    k1, k2 = jax.random.split(key)
    token_embeddings = jax.random.normal(k1, (B, S, D), dtype=jnp.float32)
    cls_token = jax.random.normal(k2, (B, D), dtype=jnp.float32)
    attention_mask = jnp.array(
        [[1, 1, 1, 1, 1, 1, 1, 1],
         [1, 1, 1, 1, 1, 0, 0, 0]], dtype=jnp.int32)

    features = {
        'token_embeddings': token_embeddings,
        'cls_token_embeddings': cls_token,
        'attention_mask': attention_mask,
    }

    module = Pooling(word_embedding_dimension=D,
                     pooling_mode_cls_token=True,
                     pooling_mode_max_tokens=True,
                     pooling_mode_mean_tokens=True,
                     pooling_mode_mean_sqrt_len_tokens=True)

    out = module(features)
    sent = jax.block_until_ready(out['sentence_embedding'])
    assert sent.shape == (B, module.get_sentence_embedding_dimension()), sent.shape
    ref = _reference_forward(features, module)
    assert jnp.allclose(sent, ref, atol=1e-5, rtol=1e-5), "mismatch vs reference (test 1)"

    # default-config (mean-only) path
    module_default = Pooling(word_embedding_dimension=D)
    out_d = module_default(features)
    sent_d = jax.block_until_ready(out_d['sentence_embedding'])
    ref_d = _reference_forward(features, module_default)
    assert sent_d.shape == (B, D)
    assert jnp.allclose(sent_d, ref_d, atol=1e-5, rtol=1e-5), "mismatch vs reference (mean-only)"

    # ---- test 2: batch not a multiple of the tile (exercises the no-pad partial block) ----
    B2, S2, D2 = 11, 16, 256
    k3, k4, k5 = jax.random.split(k2, 3)
    emb2 = jax.random.normal(k3, (B2, S2, D2), dtype=jnp.float32)
    cls2 = jax.random.normal(k4, (B2, D2), dtype=jnp.float32)
    lens = jnp.array([16, 12, 7, 1, 16, 3, 9, 16, 5, 2, 11], dtype=jnp.int32)
    mask2 = (jnp.arange(S2)[None, :] < lens[:, None]).astype(jnp.int32)
    features2 = {
        'token_embeddings': emb2,
        'cls_token_embeddings': cls2,
        'attention_mask': mask2,
    }
    module2 = Pooling(word_embedding_dimension=D2,
                      pooling_mode_cls_token=False,
                      pooling_mode_max_tokens=True,
                      pooling_mode_mean_tokens=True,
                      pooling_mode_mean_sqrt_len_tokens=False)
    out2 = module2(features2)
    sent2 = jax.block_until_ready(out2['sentence_embedding'])
    assert sent2.shape == (B2, module2.get_sentence_embedding_dimension()), sent2.shape
    ref2 = _reference_forward(features2, module2)
    assert jnp.allclose(sent2, ref2, atol=1e-5, rtol=1e-5), "mismatch vs reference (test 2)"

    # ---- test 3: bf16 embeddings (exercises bf16 max path + 16-row base tile) ----
    B3, S3, D3 = 3, 128, 256
    k6, k7 = jax.random.split(k5)
    emb3 = jax.random.normal(k6, (B3, S3, D3), dtype=jnp.float32).astype(jnp.bfloat16)
    cls3 = jax.random.normal(k7, (B3, D3), dtype=jnp.float32).astype(jnp.bfloat16)
    lens3 = jnp.array([128, 40, 7], dtype=jnp.int32)
    mask3_ = (jnp.arange(S3)[None, :] < lens3[:, None]).astype(jnp.int32)
    features3 = {
        'token_embeddings': emb3,
        'cls_token_embeddings': cls3,
        'attention_mask': mask3_,
    }
    module3 = Pooling(word_embedding_dimension=D3,
                      pooling_mode_cls_token=True,
                      pooling_mode_max_tokens=True,
                      pooling_mode_mean_tokens=True,
                      pooling_mode_mean_sqrt_len_tokens=False)
    out3 = module3(features3)
    sent3 = jax.block_until_ready(out3['sentence_embedding'])
    assert sent3.shape == (B3, module3.get_sentence_embedding_dimension()), sent3.shape
    ref3 = _reference_forward(features3, module3)
    assert jnp.allclose(sent3, ref3, atol=1e-3, rtol=1e-3), "mismatch vs reference (test 3)"

    print("KERNEL_OK")
</pallas_src>

<mosaic_0001>
module attributes {stable_mosaic.version = 11 : i64} {
  func.func @_pooling_kernel(%arg0: i32, %arg1: i32, %arg2: memref<2x8x32xf32, #tpu.memory_space<vmem>>, %arg3: memref<2x8x1xf32, #tpu.memory_space<vmem>>, %arg4: memref<2x32xf32, #tpu.memory_space<vmem>>, %arg5: memref<2x32xf32, #tpu.memory_space<vmem>>) attributes {dimension_semantics = [#tpu.dimension_semantics<parallel>, #tpu.dimension_semantics<parallel>], iteration_bounds = array<i64: 1, 1>, scalar_prefetch = 0 : i64, scratch_operands = 0 : i64, tpu.core_type = #tpu.core_type<tc>, window_params = [{transform_indices = @transform_0, window_bounds = array<i64: 2, 8, 32>}, {transform_indices = @transform_1, window_bounds = array<i64: 2, 8, 1>}, {transform_indices = @transform_2, window_bounds = array<i64: 2, 32>}, {transform_indices = @transform_3, window_bounds = array<i64: 2, 32>}]} {
    %c0 = arith.constant 0 : index
    %c0_0 = arith.constant 0 : index
    %c0_1 = arith.constant 0 : index
    %0 = vector.load %arg2[%c0, %c0_0, %c0_1] : memref<2x8x32xf32, #tpu.memory_space<vmem>>, vector<2x8x32xf32>
    %c0_2 = arith.constant 0 : index
    %c0_3 = arith.constant 0 : index
    %c0_4 = arith.constant 0 : index
    %1 = vector.load %arg3[%c0_2, %c0_3, %c0_4] : memref<2x8x1xf32, #tpu.memory_space<vmem>>, vector<2x8x1xf32>
    %2 = vector.broadcast %1 : vector<2x8x1xf32> to vector<2x8x32xf32>
    %3 = arith.mulf %0, %2 : vector<2x8x32xf32>
    %cst = arith.constant dense<0.000000e+00> : vector<2x32xf32>
    %4 = vector.multi_reduction <add>, %3, %cst [1] : vector<2x8x32xf32> to vector<2x32xf32>
    %c0_5 = arith.constant 0 : index
    %c0_6 = arith.constant 0 : index
    %5 = vector.load %arg4[%c0_5, %c0_6] : memref<2x32xf32, #tpu.memory_space<vmem>>, vector<2x32xf32>
    tpu.vector_store %arg4[%c0_5, %c0_6], %4 {strides = array<i32>} : memref<2x32xf32, #tpu.memory_space<vmem>>, vector<2x32xf32>,
    %cst_7 = arith.constant 0.000000e+00 : f32
    %6 = vector.broadcast %cst_7 : f32 to vector<2x8x1xf32>
    %7 = arith.cmpf one, %1, %6 : vector<2x8x1xf32>
    %cst_8 = arith.constant -1.000000e+09 : f32
    %8 = vector.shape_cast %7 : vector<2x8x1xi1> to vector<2x8x1xi1>
    %9 = vector.broadcast %8 : vector<2x8x1xi1> to vector<2x8x32xi1>
    %10 = vector.broadcast %cst_8 : f32 to vector<2x8x32xf32>
    %11 = arith.select %9, %0, %10 : vector<2x8x32xi1>, vector<2x8x32xf32>
    %cst_9 = arith.constant dense<0xFF800000> : vector<2x32xf32>
    %12 = vector.multi_reduction <maximumf>, %11, %cst_9 [1] : vector<2x8x32xf32> to vector<2x32xf32>
    %c0_10 = arith.constant 0 : index
    %c0_11 = arith.constant 0 : index
    %13 = vector.load %arg5[%c0_10, %c0_11] : memref<2x32xf32, #tpu.memory_space<vmem>>, vector<2x32xf32>
    tpu.vector_store %arg5[%c0_10, %c0_11], %12 {strides = array<i32>} : memref<2x32xf32, #tpu.memory_space<vmem>>, vector<2x32xf32>,
    return
  }
  func.func @transform_0(%arg0: i32, %arg1: i32) -> (i32, i32, i32) {
    %c0_i32 = arith.constant 0 : i32
    %c0_i32_0 = arith.constant 0 : i32
    return %arg0, %c0_i32, %arg1 : i32, i32, i32
  }
  func.func @transform_1(%arg0: i32, %arg1: i32) -> (i32, i32, i32) {
    %c0_i32 = arith.constant 0 : i32
    %c0_i32_0 = arith.constant 0 : i32
    %c0_i32_1 = arith.constant 0 : i32
    return %arg0, %c0_i32, %c0_i32_0 : i32, i32, i32
  }
  func.func @transform_2(%arg0: i32, %arg1: i32) -> (i32, i32) {
    %c0_i32 = arith.constant 0 : i32
    return %arg0, %arg1 : i32, i32
  }
  func.func @transform_3(%arg0: i32, %arg1: i32) -> (i32, i32) {
    %c0_i32 = arith.constant 0 : i32
    return %arg0, %arg1 : i32, i32
  }
}

</mosaic_0001>

<bundles_post_ra>
// kernel: tpu_custom_call.1
= control target key start
LH: loop header
LB: loop body
LE: loop exit
PB: predicated region body
PF: predicated region fallthrough
CT: control target
= control target key end

     0   :  { %9 = vsyncpa [#allocation3], 0  ;;  %s239_s0 = inlined_call_operand.vmem [shape: f32[2,8,32], index: 0, kind: input, shape index: {}]   ;;  %s240_s1 = inlined_call_operand.vmem [shape: f32[2,8,1], index: 1, kind: input, shape index: {}]   ;;  %s241_s2 = inlined_call_operand.hbm [shape: f32[2,32], index: 2, kind: output, shape index: {0}]   ;;  %s242_s3 = inlined_call_operand.hbm [shape: f32[2,32], index: 3, kind: output, shape index: {1}]  }
   0x1   :  { %v17_v0 = vld [vmem:[%s240_s1] sm:$0xff]  ;;  %v18_v1 = vld [vmem:[%s240_s1 + $0x8] sm:$0xff] }
   0x2   :  { %10 = vsyncpa [#allocation5], 0  ;;  %v167_v2 = vmov 0   ;;  %vm53_vm0 = vcmp.ne.f32.partialorder %v17_v0, 0.0  ;;  %vm54_vm1 = vcmp.ne.f32.partialorder %v18_v1, 0.0  ;;  %v15_v5 = vld [vmem:[%s239_s0] sm:$0xff] }
   0x3   :  { %117 = vset.pattern.permute.xlu0 %v167_v2  ;;  %118 = vset.pattern.permute.xlu1 %v167_v2  ;;  %v55_v3 = vsel %vm53_vm0, 1, %v167_v2  ;;  %v56_v4 = vsel %vm54_vm1, 1, %v167_v2  ;;  %vm31_vm2 = vcmask 261120   ;;  %v16_v9 = vld [vmem:[%s239_s0 + $0x8] sm:$0xff]  ;;  %s168_s0 = smov [#allocation2]   ;;  %vm48_vm5 = vcmask 1041409  }
   0x4   :  { %21 = vperm.xlu0 %117, %v17_v0   ;;  %58 = vperm.xlu1 %118, %v55_v3   ;;  %s92_s19 = sshll.u32 %s168_s0, 4  ;;  %s169_s20 = smov [#allocation4]   ;;  %vm51_vm6 = vcmask 254976   ;;  %s93_s19 = int_to_ptr.vmem [resolvable:$true] %s92_s19 }
   0x5   :  { %s102_s21 = sshll.u32 %s169_s20, 4  ;;  %s119_s22 = scalar_lea.vmem %s93_s19, 32  ;;  %s206_s21 = int_to_ptr.vmem [resolvable:$true] %s102_s21 }
   0x6   :  { %p120_p0 = scmp.ne.s32.totalorder %s93_s19, %s119_s22  ;;  %p124_p1 = scmp.lt.s32.totalorder %s93_s19, %s93_s19 }
   0x7   :  { %p125_p2 = scmp.lt.s32.totalorder %s119_s22, %s119_s22 }
   0x8   :  { %26 = vperm.xlu0 %117, %v18_v1   ;;  %61 = vperm.xlu1 %118, %v56_v4  }
   0x9   :  { %p126_p3 = por %p125_p2, %p124_p1 }
   0xb   :  { %p127_p4 = pnand %p126_p3, %p120_p0 }
  0x83   :  { %v22_v6 = vpop.permute.xlu0 %21  ;;  %v59_v8 = vpop.permute.xlu1 %58 }
  0x84   :  { %v29_v7 = vmul.f32 %v22_v6, %v15_v5  ;;  %vm63_vm3 = vcmp.eq.s32.totalorder %v59_v8, 1 }
  0x85   :  { %v65_v11 = vsel %vm63_vm3, %v15_v5, -1e+09 }
  0x86   :  { %v32_v10 = vsel %vm31_vm2, %v29_v7, 0.0  ;;  %v67_v13 = vsel %vm31_vm2, %v65_v11, -inf }
  0x87   :  { %v33_v12 = vrot.slane %v32_v10, 4  ;;  %v27_v14 = vpop.permute.xlu0 %26  ;;  %v68_v15 = vrot.slane %v67_v13, 4  ;;  %v62_v17 = vpop.permute.xlu1 %61 }
  0x88   :  { %v30_v16 = vmul.f32 %v27_v14, %v16_v9  ;;  %vm64_vm4 = vcmp.eq.s32.totalorder %v62_v17, 1 }
  0x89   :  { %v34_v18 = vadd.f32 %v33_v12, %v32_v10  ;;  %v69_v19 = vmax.f32 %v67_v13, %v68_v15  ;;  %v66_v21 = vsel %vm64_vm4, %v16_v9, -1e+09 }
  0x8a   :  { %v39_v20 = vsel %vm31_vm2, %v30_v16, 0.0  ;;  %v74_v24 = vsel %vm31_vm2, %v66_v21, -inf }
  0x8b   :  { %v35_v22 = vrot.slane %v34_v18, 2  ;;  %v40_v23 = vrot.slane %v39_v20, 4  ;;  %v70_v25 = vrot.slane %v69_v19, 2  ;;  %v75_v26 = vrot.slane %v74_v24, 4 }
  0x8d   :  { %v36_v27 = vadd.f32 %v35_v22, %v34_v18  ;;  %v41_v28 = vadd.f32 %v40_v23, %v39_v20  ;;  %v71_v29 = vmax.f32 %v69_v19, %v70_v25  ;;  %v76_v30 = vmax.f32 %v74_v24, %v75_v26 }
  0x8f   :  { %v42_v31 = vrot.slane %v41_v28, 2  ;;  %v77_v32 = vrot.slane %v76_v30, 2  ;;  %v37_v33 = vrot.slane %v36_v27, 1  ;;  %v72_v35 = vrot.slane %v71_v29, 1 }
  0x91   :  { %v43_v34 = vadd.f32 %v42_v31, %v41_v28  ;;  %v78_v36 = vmax.f32 %v76_v30, %v77_v32  ;;  %v38_v39 = vadd.f32 %v37_v33, %v36_v27  ;;  %v73_v42 = vmax.f32 %v71_v29, %v72_v35 }
  0x93   :  { %v44_v37 = vrot.slane %v43_v34, 1  ;;  %v79_v38 = vrot.slane %v78_v36, 1 }
  0x95   :  { %v45_v40 = vadd.f32 %v44_v37, %v43_v34  ;;  %v80_v41 = vmax.f32 %v78_v36, %v79_v38 }
  0x97   :  { %v49_v43 = vsel %vm48_vm5, %v45_v40, %v38_v39  ;;  %v83_v44 = vsel %vm48_vm5, %v80_v41, %v73_v42 }
  0x98   :  { %52 = vst.msk [vmem:[#allocation2] sm:$0x3] %vm51_vm6, %v49_v43 }
  0x99   :  { %130 = shalt.err (!%p127_p4)
}
  0x9a   :  { %s131_s25 = scalar_lea.hbm %s241_s2, 32 }
  0x9b   :  { %p132_p5 = scmp.ne.s32.totalorder %s241_s2, %s131_s25  ;;  %p135_p6 = scmp.lt.u32.totalorder %s131_s25, %s241_s2 }
  0x9d   :  { %p137_p7 = pnand %p135_p6, %p132_p5 }
  0x9f   :  { %140 = shalt.err (!%p137_p7)
}
  0xa0   :  { %95 = dma.vmem_to_hbm [thread:$0]  %s93_s19, 32, %s241_s2, [#allocation3]   ;;  %85 = vst.msk [vmem:[#allocation4] sm:$0x3] %vm51_vm6, %v83_v44 }
  0xa1   :  { %s141_s5 = scalar_lea.vmem %s206_s21, 32  ;;  %p146_p9 = scmp.lt.s32.totalorder %s206_s21, %s206_s21 }
  0xa2   :  { %p142_p8 = scmp.ne.s32.totalorder %s206_s21, %s141_s5  ;;  %p147_p10 = scmp.lt.s32.totalorder %s141_s5, %s141_s5 }
  0xa4   :  { %p148_p11 = por %p147_p10, %p146_p9 }
  0xa6   :  { %p149_p12 = pnand %p148_p11, %p142_p8 }
  0xa8   :  { %152 = shalt.err (!%p149_p12)
}
  0xa9   :  { %s153_s8 = scalar_lea.hbm %s242_s3, 32 }
  0xaa   :  { %p154_p13 = scmp.ne.s32.totalorder %s242_s3, %s153_s8  ;;  %p157_p0 = scmp.lt.u32.totalorder %s153_s8, %s242_s3 }
  0xac   :  { %p159_p1 = pnand %p157_p0, %p154_p13 }
  0xae   :  { %162 = shalt.err (!%p159_p1)
}
  0xaf   :  { %105 = dma.vmem_to_hbm [thread:$0]  %s206_s21, 32, %s242_s3, [#allocation5]  }
  0xb0   :  { %163 = dma.done.wait [#allocation3], 32  }
  0xb1   :  { %164 = vsyncadd [#allocation3], 4294967264 }
  0xb2   :  { %165 = dma.done.wait [#allocation5], 32  }
  0xb3   :  { %166 = vsyncadd [#allocation5], 4294967264 }
  0xb4   :  { %112 = vsyncpa [#allocation3], 1 }
  0xb5   :  { %113 = vsyncpa [#allocation5], 1 }

</bundles_post_ra>
